<compile_context>
chip_gen: v7x
topology: tpu7x:2x2x1
jax: 0.10.0
libtpu: 0.0.40
codegen_flags: <defaults>
</compile_context>

<pallas_src>
import functools

import jax
import jax.numpy as jnp
from jax.experimental import pallas as pl
from jax.experimental.pallas import tpu as pltpu


def _round_up(a: int, b: int) -> int:
    return (a + b - 1) // b * b


def san_graph_head_kernel(batch_ref, x_ref, w0_ref, b0_ref, w1_ref, b1_ref,
                          w2_ref, b2_ref, out_ref, sums_ref, counts_ref):
    gi = pl.program_id(0)          # graph-tile index  ("parallel")
    nj = pl.program_id(1)          # node-tile index   ("arbitrary" / streaming reduction)

    # ---- init accumulators on the first node tile of each graph tile ----
    @pl.when(nj == 0)
    def _():
        sums_ref[...] = jnp.zeros_like(sums_ref)
        counts_ref[...] = jnp.zeros_like(counts_ref)

    # ---- streaming masked-matmul segment sum over this node tile ----
    x = x_ref[...]                                     # [TN, D]  float32
    bidx = batch_ref[...]                              # [1, TN]  int32
    TB = sums_ref.shape[0]
    TN = x.shape[0]
    row_ids = jax.lax.broadcasted_iota(jnp.int32, (TB, TN), 0) + gi * TB
    mask = (row_ids == bidx).astype(jnp.float32)       # [TB, TN] one-hot graph membership
    # Both sums and counts accumulate on the MXU (frees VALU/XLU slots; f32 acc).
    sums_ref[...] += jnp.dot(mask, x, preferred_element_type=jnp.float32)
    counts_ref[...] += jnp.dot(mask, jnp.ones((TN, 1), jnp.float32),
                               preferred_element_type=jnp.float32)

    # ---- finalize: mean + MLP head, once per graph tile ----
    @pl.when(nj == pl.num_programs(1) - 1)
    def _():
        counts = counts_ref[...]
        inv = pl.reciprocal(counts, approx=True)       # EUP slot, effectively free
        inv = jnp.where(counts > 0.0, inv, 0.0)        # guard empty / padded graphs
        emb = sums_ref[...] * inv                      # mean pooling  [TB, D]
        h = jnp.dot(emb, w0_ref[...], preferred_element_type=jnp.float32) + b0_ref[...]
        h = jnp.maximum(h, 0.0)
        h = jnp.dot(h, w1_ref[...], preferred_element_type=jnp.float32) + b1_ref[...]
        h = jnp.maximum(h, 0.0)
        o = jnp.dot(h, w2_ref[...], preferred_element_type=jnp.float32) + b2_ref[...]
        out_ref[...] = o.astype(out_ref.dtype)         # lane-dense (128-wide) store


@functools.partial(jax.jit, static_argnums=(2,))
def san_graph_head(x, batch_idx, num_graphs, params):
    """x: [N, dim_in] f32, batch_idx: [N] int32 (values < num_graphs).
    Returns pred: [num_graphs, dim_out]."""
    (w0, b0), (w1, b1), (w2, b2) = params
    N, D = x.shape
    dim_out = w2.shape[1]
    H0, H1 = w0.shape[1], w1.shape[1]

    # --- tile sizes (node tile >= 512..1024 when N is large) ---
    TN = min(1024, _round_up(N, 128))
    N_pad = _round_up(N, TN)
    TB = 128 if num_graphs > 128 else _round_up(num_graphs, 8)
    B_pad = _round_up(num_graphs, TB)
    DO_pad = _round_up(dim_out, 128)                    # lane-dense output

    # --- pad inputs (sentinel batch id B_pad never matches any graph row) ---
    x_p = jnp.pad(x.astype(jnp.float32), ((0, N_pad - N), (0, 0)))
    batch_p = jnp.pad(batch_idx.astype(jnp.int32), (0, N_pad - N),
                      constant_values=B_pad).reshape(1, N_pad)
    w2_p = jnp.pad(w2, ((0, 0), (0, DO_pad - dim_out)))
    b2_p = jnp.pad(b2, ((0, 0), (0, DO_pad - dim_out)))

    grid = (B_pad // TB, N_pad // TN)

    cost = pl.CostEstimate(
        flops=2 * B_pad * N_pad * (D + 1)
              + 2 * B_pad * (D * H0 + H0 * H1 + H1 * DO_pad),
        transcendentals=B_pad,
        bytes_accessed=4 * (x_p.size + batch_p.size + w0.size + b0.size
                            + w1.size + b1.size + w2_p.size + b2_p.size
                            + B_pad * DO_pad),
    )

    out_padded = pl.pallas_call(
        san_graph_head_kernel,
        out_shape=jax.ShapeDtypeStruct((B_pad, DO_pad), jnp.float32),
        grid_spec=pltpu.PrefetchScalarGridSpec(
            num_scalar_prefetch=0,
            grid=grid,
            in_specs=[
                pl.BlockSpec((1, TN), lambda i, j: (0, j)),       # batch indices
                pl.BlockSpec((TN, D), lambda i, j: (j, 0)),       # node features (streamed)
                pl.BlockSpec((D, H0), lambda i, j: (0, 0)),       # w0 (resident)
                pl.BlockSpec((1, H0), lambda i, j: (0, 0)),       # b0
                pl.BlockSpec((H0, H1), lambda i, j: (0, 0)),      # w1
                pl.BlockSpec((1, H1), lambda i, j: (0, 0)),       # b1
                pl.BlockSpec((H1, DO_pad), lambda i, j: (0, 0)),  # w2 (lane-padded)
                pl.BlockSpec((1, DO_pad), lambda i, j: (0, 0)),   # b2
            ],
            out_specs=pl.BlockSpec((TB, DO_pad), lambda i, j: (i, 0)),
            scratch_shapes=[
                pltpu.VMEM((TB, D), jnp.float32),    # segment-sum accumulator
                pltpu.VMEM((TB, 1), jnp.float32),    # segment-count accumulator
            ],
        ),
        compiler_params=pltpu.CompilerParams(
            dimension_semantics=("parallel", "arbitrary"),
            vmem_limit_bytes=32 * 1024 * 1024,
        ),
        cost_estimate=cost,
    )(batch_p, x_p, w0, b0, w1, b1, w2_p, b2_p)

    return out_padded[:num_graphs, :dim_out]


def init_params(key, dim_in, dim_out, L=2):
    """Shapes match the PyTorch layers: Linear(dim_in//2**l, dim_in//2**(l+1))
    for l in range(L), then Linear(dim_in//2**L, dim_out).
    Stored as [in, out] weights + [1, out] biases."""
    params = []
    dims = [dim_in // (2 ** l) for l in range(L + 1)] + [dim_out]
    for din, dout in zip(dims[:-1], dims[1:]):
        key, kw, kb = jax.random.split(key, 3)
        bound = 1.0 / jnp.sqrt(jnp.float32(din))
        w = jax.random.uniform(kw, (din, dout), jnp.float32, -bound, bound)
        b = jax.random.uniform(kb, (1, dout), jnp.float32, -bound, bound)
        params.append((w, b))
    return params


def san_graph_head_ref(x, batch_idx, num_graphs, params):
    """Pure-JAX reference for validation."""
    (w0, b0), (w1, b1), (w2, b2) = params
    sums = jax.ops.segment_sum(x, batch_idx, num_segments=num_graphs)
    counts = jax.ops.segment_sum(jnp.ones((x.shape[0], 1), x.dtype), batch_idx,
                                 num_segments=num_graphs)
    emb = sums / counts
    h = jnp.maximum(emb @ w0 + b0, 0.0)
    h = jnp.maximum(h @ w1 + b1, 0.0)
    return h @ w2 + b2


# TODO(synk): concat_e / pre_pooled / use_graphHC config branches are disabled
# by default in the reference config and are not implemented in the kernel.

if __name__ == "__main__":
    key = jax.random.PRNGKey(0)
    N, B, dim_in, dim_out, L = 32, 4, 32, 1, 2

    key, kx = jax.random.split(key)
    x = jax.random.normal(kx, (N, dim_in), jnp.float32)
    # Non-uniform graph sizes (sorted node-to-graph assignment as in PyG batching).
    sizes = [7, 9, 8, 8]
    batch_idx = jnp.concatenate(
        [jnp.full((s,), g, jnp.int32) for g, s in enumerate(sizes)])
    y = jnp.arange(B, dtype=jnp.float32).reshape(B, 1)   # synthetic labels

    params = init_params(key, dim_in, dim_out, L)

    pred = san_graph_head(x, batch_idx, B, params)
    pred = jax.block_until_ready(pred)
    label = y  # forward returns (batch.graph_feature, batch.y)

    ref = san_graph_head_ref(x, batch_idx, B, params)
    assert pred.shape == (B, dim_out)
    assert jnp.allclose(pred, ref, atol=1e-3, rtol=1e-3), "mismatch vs JAX reference"

    print("KERNEL_OK")
</pallas_src>

<mosaic_0001>
module attributes {stable_mosaic.version = 11 : i64} {
  func.func @san_graph_head_kernel(%arg0: i32, %arg1: i32, %arg2: memref<1x128xi32, #tpu.memory_space<vmem>>, %arg3: memref<128x32xf32, #tpu.memory_space<vmem>>, %arg4: memref<32x16xf32, #tpu.memory_space<vmem>>, %arg5: memref<1x16xf32, #tpu.memory_space<vmem>>, %arg6: memref<16x8xf32, #tpu.memory_space<vmem>>, %arg7: memref<1x8xf32, #tpu.memory_space<vmem>>, %arg8: memref<8x128xf32, #tpu.memory_space<vmem>>, %arg9: memref<1x128xf32, #tpu.memory_space<vmem>>, %arg10: memref<8x128xf32, #tpu.memory_space<vmem>>, %arg11: memref<8x32xf32, #tpu.memory_space<vmem>>, %arg12: memref<8x1xf32, #tpu.memory_space<vmem>>) attributes {dimension_semantics = [#tpu.dimension_semantics<parallel>, #tpu.dimension_semantics<arbitrary>], iteration_bounds = array<i64: 1, 1>, scalar_prefetch = 0 : i64, scratch_operands = 2 : i64, tpu.core_type = #tpu.core_type<tc>, window_params = [{transform_indices = @transform_0, window_bounds = array<i64: 1, 128>}, {transform_indices = @transform_1, window_bounds = array<i64: 128, 32>}, {pipeline_mode = #tpu.pipeline_mode<synchronous>, transform_indices = @transform_2, window_bounds = array<i64: 32, 16>}, {pipeline_mode = #tpu.pipeline_mode<synchronous>, transform_indices = @transform_3, window_bounds = array<i64: 1, 16>}, {pipeline_mode = #tpu.pipeline_mode<synchronous>, transform_indices = @transform_4, window_bounds = array<i64: 16, 8>}, {pipeline_mode = #tpu.pipeline_mode<synchronous>, transform_indices = @transform_5, window_bounds = array<i64: 1, 8>}, {pipeline_mode = #tpu.pipeline_mode<synchronous>, transform_indices = @transform_6, window_bounds = array<i64: 8, 128>}, {pipeline_mode = #tpu.pipeline_mode<synchronous>, transform_indices = @transform_7, window_bounds = array<i64: 1, 128>}, {transform_indices = @transform_8, window_bounds = array<i64: 8, 128>}]} {
    %c0_i32 = arith.constant 0 : i32
    %0 = arith.cmpi eq, %arg1, %c0_i32 : i32
    %1 = arith.extui %0 : i1 to i32
    %c0_i32_0 = arith.constant 0 : i32
    %2 = arith.cmpi ne, %1, %c0_i32_0 : i32
    scf.if %2 {
      %cst_16 = arith.constant 0.000000e+00 : f32
      %25 = vector.broadcast %cst_16 : f32 to vector<8x32xf32>
      %c0_17 = arith.constant 0 : index
      %c0_18 = arith.constant 0 : index
      %26 = vector.load %arg11[%c0_17, %c0_18] : memref<8x32xf32, #tpu.memory_space<vmem>>, vector<8x32xf32>
      tpu.vector_store %arg11[%c0_17, %c0_18], %25 {strides = array<i32>} : memref<8x32xf32, #tpu.memory_space<vmem>>, vector<8x32xf32>,
      %cst_19 = arith.constant 0.000000e+00 : f32
      %27 = vector.broadcast %cst_19 : f32 to vector<8x1xf32>
      %c0_20 = arith.constant 0 : index
      %c0_21 = arith.constant 0 : index
      %28 = vector.load %arg12[%c0_20, %c0_21] : memref<8x1xf32, #tpu.memory_space<vmem>>, vector<8x1xf32>
      tpu.vector_store %arg12[%c0_20, %c0_21], %27 {strides = array<i32>} : memref<8x1xf32, #tpu.memory_space<vmem>>, vector<8x1xf32>,
    } else {
    }
    %c0 = arith.constant 0 : index
    %c0_1 = arith.constant 0 : index
    %3 = vector.load %arg3[%c0, %c0_1] : memref<128x32xf32, #tpu.memory_space<vmem>>, vector<128x32xf32>
    %c0_2 = arith.constant 0 : index
    %c0_3 = arith.constant 0 : index
    %4 = vector.load %arg2[%c0_2, %c0_3] : memref<1x128xi32, #tpu.memory_space<vmem>>, vector<1x128xi32>
    %5 = tpu.iota {dimensions = array<i32: 0>} : vector<8x128xi32>
    %c8_i32 = arith.constant 8 : i32
    %6 = arith.muli %arg0, %c8_i32 : i32
    %7 = vector.broadcast %6 : i32 to vector<8x128xi32>
    %8 = arith.addi %5, %7 : vector<8x128xi32>
    %9 = vector.broadcast %4 : vector<1x128xi32> to vector<8x128xi32>
    %10 = arith.cmpi eq, %8, %9 : vector<8x128xi32>
    %11 = arith.extui %10 : vector<8x128xi1> to vector<8x128xi32>
    %12 = arith.sitofp %11 : vector<8x128xi32> to vector<8x128xf32>
    %c0_4 = arith.constant 0 : index
    %c0_5 = arith.constant 0 : index
    %13 = vector.load %arg11[%c0_4, %c0_5] : memref<8x32xf32, #tpu.memory_space<vmem>>, vector<8x32xf32>
    %cst = arith.constant dense<0.000000e+00> : vector<8x32xf32>
    %14 = tpu.matmul %12, %3, %cst {dimension_numbers = #tpu.dot_dimension_numbers<[1], [0], [0], [1], [0, 0, 1, 1], [], []>} : vector<8x128xf32>, vector<128x32xf32>, vector<8x32xf32> -> vector<8x32xf32>
    %15 = arith.addf %13, %14 : vector<8x32xf32>
    %c0_6 = arith.constant 0 : index
    %c0_7 = arith.constant 0 : index
    %16 = vector.load %arg11[%c0_6, %c0_7] : memref<8x32xf32, #tpu.memory_space<vmem>>, vector<8x32xf32>
    tpu.vector_store %arg11[%c0_6, %c0_7], %15 {strides = array<i32>} : memref<8x32xf32, #tpu.memory_space<vmem>>, vector<8x32xf32>,
    %c0_8 = arith.constant 0 : index
    %c0_9 = arith.constant 0 : index
    %17 = vector.load %arg12[%c0_8, %c0_9] : memref<8x1xf32, #tpu.memory_space<vmem>>, vector<8x1xf32>
    %cst_10 = arith.constant 1.000000e+00 : f32
    %18 = vector.broadcast %cst_10 : f32 to vector<128x1xf32>
    %cst_11 = arith.constant dense<0.000000e+00> : vector<8x1xf32>
    %19 = tpu.matmul %12, %18, %cst_11 {dimension_numbers = #tpu.dot_dimension_numbers<[1], [0], [0], [1], [0, 0, 1, 1], [], []>} : vector<8x128xf32>, vector<128x1xf32>, vector<8x1xf32> -> vector<8x1xf32>
    %20 = arith.addf %17, %19 : vector<8x1xf32>
    %c0_12 = arith.constant 0 : index
    %c0_13 = arith.constant 0 : index
    %21 = vector.load %arg12[%c0_12, %c0_13] : memref<8x1xf32, #tpu.memory_space<vmem>>, vector<8x1xf32>
    tpu.vector_store %arg12[%c0_12, %c0_13], %20 {strides = array<i32>} : memref<8x1xf32, #tpu.memory_space<vmem>>, vector<8x1xf32>,
    %c0_i32_14 = arith.constant 0 : i32
    %22 = arith.cmpi eq, %arg1, %c0_i32_14 : i32
    %23 = arith.extui %22 : i1 to i32
    %c0_i32_15 = arith.constant 0 : i32
    %24 = arith.cmpi ne, %23, %c0_i32_15 : i32
    scf.if %24 {
      %c0_16 = arith.constant 0 : index
      %c0_17 = arith.constant 0 : index
      %25 = vector.load %arg12[%c0_16, %c0_17] : memref<8x1xf32, #tpu.memory_space<vmem>>, vector<8x1xf32>
      %26 = tpu.reciprocal %25 {approx = true} : vector<8x1xf32> -> vector<8x1xf32>
      %cst_18 = arith.constant 0.000000e+00 : f32
      %27 = vector.broadcast %cst_18 : f32 to vector<8x1xf32>
      %28 = arith.cmpf ogt, %25, %27 : vector<8x1xf32>
      %cst_19 = arith.constant 0.000000e+00 : f32
      %29 = vector.broadcast %cst_19 : f32 to vector<8x1xf32>
      %30 = arith.select %28, %26, %29 : vector<8x1xi1>, vector<8x1xf32>
      %c0_20 = arith.constant 0 : index
      %c0_21 = arith.constant 0 : index
      %31 = vector.load %arg11[%c0_20, %c0_21] : memref<8x32xf32, #tpu.memory_space<vmem>>, vector<8x32xf32>
      %32 = vector.broadcast %30 : vector<8x1xf32> to vector<8x32xf32>
      %33 = arith.mulf %31, %32 : vector<8x32xf32>
      %c0_22 = arith.constant 0 : index
      %c0_23 = arith.constant 0 : index
      %34 = vector.load %arg4[%c0_22, %c0_23] : memref<32x16xf32, #tpu.memory_space<vmem>>, vector<32x16xf32>
      %cst_24 = arith.constant dense<0.000000e+00> : vector<8x16xf32>
      %35 = tpu.matmul %33, %34, %cst_24 {dimension_numbers = #tpu.dot_dimension_numbers<[1], [0], [0], [1], [0, 0, 1, 1], [], []>} : vector<8x32xf32>, vector<32x16xf32>, vector<8x16xf32> -> vector<8x16xf32>
      %c0_25 = arith.constant 0 : index
      %c0_26 = arith.constant 0 : index
      %36 = vector.load %arg5[%c0_25, %c0_26] : memref<1x16xf32, #tpu.memory_space<vmem>>, vector<1x16xf32>
      %37 = vector.broadcast %36 : vector<1x16xf32> to vector<8x16xf32>
      %38 = arith.addf %35, %37 : vector<8x16xf32>
      %cst_27 = arith.constant 0.000000e+00 : f32
      %39 = vector.broadcast %cst_27 : f32 to vector<8x16xf32>
      %40 = arith.maximumf %38, %39 : vector<8x16xf32>
      %c0_28 = arith.constant 0 : index
      %c0_29 = arith.constant 0 : index
      %41 = vector.load %arg6[%c0_28, %c0_29] : memref<16x8xf32, #tpu.memory_space<vmem>>, vector<16x8xf32>
      %cst_30 = arith.constant dense<0.000000e+00> : vector<8x8xf32>
      %42 = tpu.matmul %40, %41, %cst_30 {dimension_numbers = #tpu.dot_dimension_numbers<[1], [0], [0], [1], [0, 0, 1, 1], [], []>} : vector<8x16xf32>, vector<16x8xf32>, vector<8x8xf32> -> vector<8x8xf32>
      %c0_31 = arith.constant 0 : index
      %c0_32 = arith.constant 0 : index
      %43 = vector.load %arg7[%c0_31, %c0_32] : memref<1x8xf32, #tpu.memory_space<vmem>>, vector<1x8xf32>
      %44 = vector.broadcast %43 : vector<1x8xf32> to vector<8x8xf32>
      %45 = arith.addf %42, %44 : vector<8x8xf32>
      %cst_33 = arith.constant 0.000000e+00 : f32
      %46 = vector.broadcast %cst_33 : f32 to vector<8x8xf32>
      %47 = arith.maximumf %45, %46 : vector<8x8xf32>
      %c0_34 = arith.constant 0 : index
      %c0_35 = arith.constant 0 : index
      %48 = vector.load %arg8[%c0_34, %c0_35] : memref<8x128xf32, #tpu.memory_space<vmem>>, vector<8x128xf32>
      %cst_36 = arith.constant dense<0.000000e+00> : vector<8x128xf32>
      %49 = tpu.matmul %47, %48, %cst_36 {dimension_numbers = #tpu.dot_dimension_numbers<[1], [0], [0], [1], [0, 0, 1, 1], [], []>} : vector<8x8xf32>, vector<8x128xf32>, vector<8x128xf32> -> vector<8x128xf32>
      %c0_37 = arith.constant 0 : index
      %c0_38 = arith.constant 0 : index
      %50 = vector.load %arg9[%c0_37, %c0_38] : memref<1x128xf32, #tpu.memory_space<vmem>>, vector<1x128xf32>
      %51 = vector.broadcast %50 : vector<1x128xf32> to vector<8x128xf32>
      %52 = arith.addf %49, %51 : vector<8x128xf32>
      %c0_39 = arith.constant 0 : index
      %c0_40 = arith.constant 0 : index
      %53 = vector.load %arg10[%c0_39, %c0_40] : memref<8x128xf32, #tpu.memory_space<vmem>>, vector<8x128xf32>
      tpu.vector_store %arg10[%c0_39, %c0_40], %52 {strides = array<i32>} : memref<8x128xf32, #tpu.memory_space<vmem>>, vector<8x128xf32>,
    } else {
    }
    return
  }
  func.func @transform_0(%arg0: i32, %arg1: i32) -> (i32, i32) {
    %c0_i32 = arith.constant 0 : i32
    %c0_i32_0 = arith.constant 0 : i32
    return %c0_i32, %arg1 : i32, i32
  }
  func.func @transform_1(%arg0: i32, %arg1: i32) -> (i32, i32) {
    %c0_i32 = arith.constant 0 : i32
    %c0_i32_0 = arith.constant 0 : i32
    return %arg1, %c0_i32 : i32, i32
  }
  func.func @transform_2(%arg0: i32, %arg1: i32) -> (i32, i32) {
    %c0_i32 = arith.constant 0 : i32
    %c0_i32_0 = arith.constant 0 : i32
    %c0_i32_1 = arith.constant 0 : i32
    return %c0_i32, %c0_i32_0 : i32, i32
  }
  func.func @transform_3(%arg0: i32, %arg1: i32) -> (i32, i32) {
    %c0_i32 = arith.constant 0 : i32
    %c0_i32_0 = arith.constant 0 : i32
    %c0_i32_1 = arith.constant 0 : i32
    return %c0_i32, %c0_i32_0 : i32, i32
  }
  func.func @transform_4(%arg0: i32, %arg1: i32) -> (i32, i32) {
    %c0_i32 = arith.constant 0 : i32
    %c0_i32_0 = arith.constant 0 : i32
    %c0_i32_1 = arith.constant 0 : i32
    return %c0_i32, %c0_i32_0 : i32, i32
  }
  func.func @transform_5(%arg0: i32, %arg1: i32) -> (i32, i32) {
    %c0_i32 = arith.constant 0 : i32
    %c0_i32_0 = arith.constant 0 : i32
    %c0_i32_1 = arith.constant 0 : i32
    return %c0_i32, %c0_i32_0 : i32, i32
  }
  func.func @transform_6(%arg0: i32, %arg1: i32) -> (i32, i32) {
    %c0_i32 = arith.constant 0 : i32
    %c0_i32_0 = arith.constant 0 : i32
    %c0_i32_1 = arith.constant 0 : i32
    return %c0_i32, %c0_i32_0 : i32, i32
  }
  func.func @transform_7(%arg0: i32, %arg1: i32) -> (i32, i32) {
    %c0_i32 = arith.constant 0 : i32
    %c0_i32_0 = arith.constant 0 : i32
    %c0_i32_1 = arith.constant 0 : i32
    return %c0_i32, %c0_i32_0 : i32, i32
  }
  func.func @transform_8(%arg0: i32, %arg1: i32) -> (i32, i32) {
    %c0_i32 = arith.constant 0 : i32
    %c0_i32_0 = arith.constant 0 : i32
    return %arg0, %c0_i32 : i32, i32
  }
}

</mosaic_0001>

<bundles_post_ra>
// kernel: san_graph_head.1
= control target key start
LH: loop header
LB: loop body
LE: loop exit
PB: predicated region body
PF: predicated region fallthrough
CT: control target
= control target key end

     0   :  { %v689_v0 = vmov 0.0|0.0   ;;  %vm690_vm0 = vmmov 0   ;;  %v691_v1 = vmov 0.0   ;;  %vm35_vm1 = vcmask 7168   ;;  %s861_s1 = inlined_call_operand.vmem [shape: f32[128,32], index: 1, kind: input, shape index: {}]   ;;  %s862_s0 = inlined_call_operand.vmem [shape: s32[1,128], index: 0, kind: input, shape index: {}]   ;;  %s863_s2 = inlined_call_operand.vmem [shape: f32[32,16], index: 2, kind: input, shape index: {}]   ;;  %s864_s4 = inlined_call_operand.vmem [shape: f32[16,8], index: 4, kind: input, shape index: {}]   ;;  %s865_s3 = inlined_call_operand.vmem [shape: f32[1,16], index: 3, kind: input, shape index: {}]   ;;  %s866_s6 = inlined_call_operand.vmem [shape: f32[8,128], index: 6, kind: input, shape index: {}]   ;;  %s867_s5 = inlined_call_operand.vmem [shape: f32[1,8], index: 5, kind: input, shape index: {}]   ;;  %s868_s7 = inlined_call_operand.vmem [shape: f32[1,128], index: 7, kind: input, shape index: {}]   ;;  %s869_s8 = inlined_call_operand.vmem [shape: f32[8,128], index: 8, kind: output, shape index: {}]  }
   0x1   :  { %655 = vmatprep.subr.bf16.mxu1 %v689_v0  ;;  %605 = vmatprep.mubr.msk.f32.mxu1 %vm690_vm0, %v691_v1  ;;  %v37_v2 = vld [vmem:[%s861_s1] sm:$0xff]  ;;  %v38_v3 = vld [vmem:[%s861_s1 + $0x8] sm:$0xff]  ;;  %v692_v4 = vmov 1.0|1.0   ;;  %v39_v6 = vld [vmem:[%s861_s1 + $0x10] sm:$0xff]  ;;  %36 = vst.msk [vmem:[#allocation3] sm:$0xff] %vm35_vm1, %v691_v1  ;;  %v54_v23 = vlaneseq }
   0x2   :  { %656 = vmatpush3.bf16.msra.mxu1 %v692_v4  ;;  %631 = vmatprep.subr.bf16.mxu0 %v689_v0  ;;  %v632_v5 = vpack.c.bf16 %v38_v3, %v37_v2  ;;  %v40_v7 = vld [vmem:[%s861_s1 + $0x18] sm:$0xff]  ;;  %v41_v9 = vld [vmem:[%s861_s1 + $0x20] sm:$0xff]  ;;  %v42_v10 = vld [vmem:[%s861_s1 + $0x28] sm:$0xff]  ;;  %v693_v30 = vmov 1.0   ;;  %v694_v31 = vmov 0   ;;  %vm33_vm3 = vcmask 261120  }
   0x3   :  { %657 = vmatprep.subr.bf16.mxu1 %v689_v0  ;;  %570 = vmatprep.mubr.msk.f32.mxu0 %vm690_vm0, %v691_v1  ;;  %v635_v8 = vpack.c.bf16 %v40_v7, %v39_v6  ;;  %v638_v11 = vpack.c.bf16 %v42_v10, %v41_v9  ;;  %v43_v12 = vld [vmem:[%s861_s1 + $0x30] sm:$0xff]  ;;  %v44_v13 = vld [vmem:[%s861_s1 + $0x38] sm:$0xff]  ;;  %v45_v15 = vld [vmem:[%s861_s1 + $0x40] sm:$0xff]  ;;  %v55_v27 = vshrl.u32 %v54_v23, 7  ;;  %34 = vst.msk [vmem:[#allocation2] sm:$0xff] %vm33_vm3, %v691_v1  ;;  %vm322_vm5 = vcmask 130048  }
   0x4   :  { %633 = vmatpush3.bf16.msra.mxu0 %v632_v5  ;;  %v641_v14 = vpack.c.bf16 %v44_v13, %v43_v12  ;;  %v46_v16 = vld [vmem:[%s861_s1 + $0x48] sm:$0xff]  ;;  %v47_v18 = vld [vmem:[%s861_s1 + $0x50] sm:$0xff]  ;;  %v48_v19 = vld [vmem:[%s861_s1 + $0x58] sm:$0xff]  ;;  %686 = vset.pattern.permute.xlu0 %v694_v31  ;;  %vm405_vm6 = vcmask 64512  }
   0x5   :  { %634 = vmatprep.subr.bf16.mxu0 %v689_v0  ;;  %v644_v17 = vpack.c.bf16 %v46_v16, %v45_v15  ;;  %v647_v20 = vpack.c.bf16 %v48_v19, %v47_v18  ;;  %v49_v21 = vld [vmem:[%s861_s1 + $0x60] sm:$0xff]  ;;  %v50_v22 = vld [vmem:[%s861_s1 + $0x68] sm:$0xff]  ;;  %v51_v25 = vld [vmem:[%s861_s1 + $0x70] sm:$0xff] }
   0x6   :  { %658 = vmatpush3.bf16.msra.mxu1 %v692_v4  ;;  %v650_v24 = vpack.c.bf16 %v50_v22, %v49_v21  ;;  %v52_v26 = vld [vmem:[%s861_s1 + $0x78] sm:$0xff]  ;;  %v484_v28 = vld [vmem:[%s862_s0] ss:$0 sm:$0xff]  ;;  %v229_v33 = vld [vmem:[%s863_s2 + $0x8] sm:$0xff] }
   0x7   :  { %659 = vmatprep.subr.bf16.mxu1 %v689_v0  ;;  %v653_v29 = vpack.c.bf16 %v52_v26, %v51_v25  ;;  %vm63_vm2 = vcmp.eq.s32.totalorder %v55_v27, %v484_v28  ;;  %v228_v32 = vld [vmem:[%s863_s2] sm:$0xff]  ;;  %v230_v44 = vld [vmem:[%s863_s2 + $0x10] sm:$0xff]  ;;  %v231_v45 = vld [vmem:[%s863_s2 + $0x18] sm:$0xff] }
   0x8   :  { %636 = vmatpush3.bf16.msra.mxu0 %v635_v8  ;;  %v672_v34 = vpack.c.bf16 %v229_v33, %v228_v32  ;;  %v140_v35 = vld [vmem:[#allocation3] sm:$0xff]  ;;  %v675_v46 = vpack.c.bf16 %v231_v45, %v230_v44  ;;  %v313_v52 = vld [vmem:[%s864_s4] sm:$0xff] }
   0x9   :  { %637 = vmatprep.subr.bf16.mxu0 %v689_v0  ;;  %v314_v53 = vld [vmem:[%s864_s4 + $0x8] sm:$0xff]  ;;  %v488_v55 = vld [vmem:[%s865_s3] ss:$0 sm:$0xff] }
   0xa   :  { %660 = vmatpush3.bf16.msra.mxu1 %v692_v4  ;;  %v66_v37 = vld [vmem:[#allocation2] sm:$0xff]  ;;  %v678_v54 = vpack.c.bf16 %v314_v53, %v313_v52 }
   0xb   :  { %661 = vmatprep.subr.bf16.mxu1 %v689_v0  ;;  %v397_v60 = vld [vmem:[%s866_s6] sm:$0xff] }
   0xc   :  { %639 = vmatpush3.bf16.msra.mxu0 %v638_v11  ;;  %v490_v61 = vld [vmem:[%s867_s5] ss:$0 sm:$0xff] }
   0xd   :  { %640 = vmatprep.subr.bf16.mxu0 %v689_v0  ;;  %v492_v3 = vld [vmem:[%s868_s7] ss:$0 sm:$0xff] }
   0xe   :  { %662 = vmatpush3.bf16.msra.mxu1 %v692_v4 }
   0xf   :  { %663 = vmatprep.subr.bf16.mxu1 %v689_v0 }
  0x10   :  { %642 = vmatpush3.bf16.msra.mxu0 %v641_v14 }
  0x11   :  { %643 = vmatprep.subr.bf16.mxu0 %v689_v0 }
  0x12   :  { %664 = vmatpush3.bf16.msra.mxu1 %v692_v4 }
  0x13   :  { %665 = vmatprep.subr.bf16.mxu1 %v689_v0 }
  0x14   :  { %645 = vmatpush3.bf16.msra.mxu0 %v644_v17 }
  0x15   :  { %646 = vmatprep.subr.bf16.mxu0 %v689_v0 }
  0x16   :  { %666 = vmatpush3.bf16.msra.mxu1 %v692_v4 }
  0x17   :  { %667 = vmatprep.subr.bf16.mxu1 %v689_v0 }
  0x18   :  { %648 = vmatpush3.bf16.msra.mxu0 %v647_v20 }
  0x19   :  { %649 = vmatprep.subr.bf16.mxu0 %v689_v0 }
  0x1a   :  { %668 = vmatpush3.bf16.msra.mxu1 %v692_v4 }
  0x1b   :  { %669 = vmatprep.subr.bf16.mxu1 %v689_v0 }
  0x1c   :  { %651 = vmatpush3.bf16.msra.mxu0 %v650_v24 }
  0x1d   :  { %652 = vmatprep.subr.bf16.mxu0 %v689_v0 }
  0x1e   :  { %670 = vmatpush3.bf16.msra.mxu1 %v692_v4 }
  0x1f   :  { %677 = vmatprep.subr.bf16.mxu1 %v689_v0 }
  0x20   :  { %654 = vmatpush3.bf16.msra.mxu0 %v653_v29 }
  0x21   :  { %606 = vmatmul.mubr.msk.f32.vlgmr.msra.gmra.mrb[0].mxu1 %vm63_vm2, %v693_v30  ;;  %671 = vmatprep.subr.bf16.mxu0 %v689_v0 }
  0x22   :  { %623 = vmatprep.mubr.msk.f32.mxu1 %vm690_vm0, %v691_v1  ;;  %679 = vmatpush3.bf16.msra.mxu1 %v678_v54 }
  0x23   :  { %571 = vmatmul.mubr.msk.f32.vlgmr.msra.gmra.mrb[0].mxu0 %vm63_vm2, %v693_v30  ;;  %626 = vmatprep.subr.mxu1 %v691_v1 }
  0x24   :  { %616 = vmatprep.mubr.msk.f32.mxu0 %vm690_vm0, %v691_v1  ;;  %673 = vmatpush3.bf16.msra.mxu0 %v672_v34 }
  0x25   :  { %674 = vmatprep.subr.bf16.mxu0 %v689_v0 }
  0x28   :  { %676 = vmatpush3.bf16.msra.mxu0 %v675_v46 }
  0xf4   :  { %v207_v36 = vpop.f32.mrb[0].mxu1 }
  0xf5   :  { %v211_v38 = vadd.f32 %v207_v36, %v140_v35  ;;  %v607_v39 = vpop.f32.mrb[1].mxu1 }
  0xf6   :  { %v133_v40 = vpop.f32.mrb[0].mxu0 }
  0xf7   :  { %213 = vst.msk [vmem:[#allocation3] sm:$0xff] %vm35_vm1, %v211_v38  ;;  %v137_v41 = vadd.f32 %v133_v40, %v66_v37  ;;  %v572_v42 = vpop.f32.mrb[1].mxu0 }
  0xf9   :  { %139 = vst.msk [vmem:[#allocation2] sm:$0xff] %vm33_vm3, %v137_v41 }
  0xfe   :  { %v217_v43 = vld [vmem:[#allocation3] sm:$0xff] }
  0xff   :  { %687 = vrcp.f32 %v217_v43  ;;  %vm219_vm4 = vcmp.gt.f32.partialorder %v217_v43, 0.0 }
 0x100   :  { %v221_v49 = vld [vmem:[#allocation2] sm:$0xff] }
 0x109   :  { %v688_v47 = vpop.eup %687 }
 0x10a   :  { %v220_v48 = vsel %vm219_vm4, %v688_v47, 0.0 }
 0x10b   :  { %224 = vperm.xlu0 %686, %v220_v48  }
 0x18a   :  { %v225_v50 = vpop.permute.xlu0 %224 }
 0x18b   :  { %v227_v51 = vmul.f32 %v225_v50, %v221_v49 }
 0x18d   :  { %617 = vmatmul.mubr.msk.f32.vlgmr.msra.gmra.mrb[2].mxu0 %vm33_vm3, %v227_v51 }
 0x260   :  { %v308_v56 = vpop.f32.mrb[2].mxu0 }
 0x261   :  { %v309_v57 = vadd.f32 %v488_v55, %v308_v56  ;;  %v618_v58 = vpop.f32.mrb[3].mxu0 }
 0x263   :  { %v312_v59 = vmax.f32 %v309_v57, 0.0 }
 0x265   :  { %624 = vmatmul.mubr.msk.f32.vlgmr.msra.gmra.mrb[2].mxu1 %vm322_vm5, %v312_v59 }
 0x266   :  { %628 = vmatprep.mubr.msk.f32.mxu1 %vm690_vm0, %v691_v1  ;;  %627 = vmatpush3.msra.mxu1 %v397_v60 }
 0x338   :  { %v392_v62 = vpop.f32.mrb[2].mxu1 }
 0x339   :  { %v393_v63 = vadd.f32 %v490_v61, %v392_v62  ;;  %v625_v0 = vpop.f32.mrb[3].mxu1 }
 0x33b   :  { %v396_v2 = vmax.f32 %v393_v63, 0.0 }
 0x33d   :  { %629 = vmatmul.mubr.msk.f32.vlgmr.msra.gmra.mrb[4].mxu1 %vm405_vm6, %v396_v2 }
 0x410   :  { %v475_v1 = vpop.f32.mrb[4].mxu1 }
 0x411   :  { %v476_v4 = vadd.f32 %v492_v3, %v475_v1  ;;  %v630_v5 = vpop.f32.mrb[5].mxu1 }
 0x413   :  { %479 = vst [vmem:[%s869_s8] sm:$0xff] %v476_v4 }

</bundles_post_ra>
